<compile_context>
chip_gen: v7x
topology: tpu7x:2x2x1
jax: 0.10.0
libtpu: 0.0.40
codegen_flags: <defaults>
</compile_context>

<pallas_src>
import functools

import jax
import jax.numpy as jnp
from jax.experimental import pallas as pl
from jax.experimental.pallas import tpu as pltpu

LANE = 128           # pad feature dims to multiples of the vreg lane width
SUBLANE_BF16 = 16    # pad bf16 node/graph (sublane) dims to multiples of 16 (2 rows / packed sublane)
BN_EPS = 1e-5


def _round_up(n, m):
    return ((n + m - 1) // m) * m


def _pad_to(x, shape):
    return jnp.pad(x, [(0, s - d) for d, s in zip(x.shape, shape)])


def _nbytes(a):
    return a.size * jnp.dtype(a.dtype).itemsize


# ----------------------------------------------------------------------------
# Fused kernel: all GIN layers + global_add_pool + head MLP in one pallas_call.
#   for l in layers:  x = ReLU( ReLU( (A@x) @ W1'_l + b1'_l ) @ W2_l + b2_l )
#   out = ReLU( (P @ x) @ Hw1 + Hb1 ) @ Hw2 + Hb2
# (W1'/b1' carry the folded eval-mode BatchNorm; weights are bf16, biases f32.)
# ----------------------------------------------------------------------------
def _gin_fused_kernel(a_ref, x_ref, w1s_ref, b1s_ref, w2s_ref, b2s_ref,
                      p_ref, hw1_ref, hb1_ref, hw2_ref, hb2_ref, o_ref,
                      *, num_layers):
    a_bf = a_ref[...]                      # (N, N) bf16 adjacency (exact small ints)
    x = x_ref[...]                         # (N, D) bf16 activations, VMEM-resident
    # TODO(synk): if num_layers grows beyond a handful, switch this unrolled loop
    # to lax.fori_loop carrying x (weights indexed dynamically via w1s_ref[l]).
    for l in range(num_layers):
        # GIN aggregation (dominant N^2 matmul): bf16 x bf16 on the MXU, f32 accumulate.
        agg = jnp.dot(a_bf, x, preferred_element_type=jnp.float32)
        # Linear1 with BatchNorm (eval) folded into W1/b1; bias-add + ReLU stay f32 (v5e-safe).
        h = jnp.dot(agg.astype(jnp.bfloat16), w1s_ref[l],
                    preferred_element_type=jnp.float32) + b1s_ref[l]
        h = jnp.maximum(h, 0.0)
        # Linear2 + ReLU (the module's outer F.relu is then a no-op)
        h = jnp.dot(h.astype(jnp.bfloat16), w2s_ref[l],
                    preferred_element_type=jnp.float32) + b2s_ref[l]
        # single layer-boundary cast back to bf16 for the next aggregation
        x = jnp.maximum(h, 0.0).astype(jnp.bfloat16)
    # Readout: global_add_pool expressed as P @ x (P is one-hot -> bf16-exact), then head MLP
    pooled = jnp.dot(p_ref[...], x, preferred_element_type=jnp.float32)
    h = jnp.dot(pooled.astype(jnp.bfloat16), hw1_ref[...],
                preferred_element_type=jnp.float32) + hb1_ref[...]
    h = jnp.maximum(h, 0.0)
    o_ref[...] = jnp.dot(h.astype(jnp.bfloat16), hw2_ref[...],
                         preferred_element_type=jnp.float32) + hb2_ref[...]


# ----------------------------------------------------------------------------
# Parameter prep: fold BN into W1/b1, zero-pad to lane-dense shapes, stack layers.
# Weights -> bf16 (MXU operands); biases stay f32 (VPU adds).
# ----------------------------------------------------------------------------
def fold_bn(w1, b1, gamma, beta, mean, var, eps=BN_EPS):
    scale = gamma * jax.lax.rsqrt(var + eps)        # (1, H)
    return w1 * scale, (b1 - mean) * scale + beta


def prepare_kernel_params(layers, head, d):
    w1s, b1s, w2s, b2s = [], [], [], []
    for lp in layers:
        w1f, b1f = fold_bn(lp["w1"], lp["b1"], lp["gamma"], lp["beta"],
                           lp["mean"], lp["var"])
        w1s.append(_pad_to(w1f, (d, d)).astype(jnp.bfloat16))
        b1s.append(_pad_to(b1f, (1, d)))
        w2s.append(_pad_to(lp["w2"], (d, d)).astype(jnp.bfloat16))
        b2s.append(_pad_to(lp["b2"], (1, d)))
    return (jnp.stack(w1s), jnp.stack(b1s), jnp.stack(w2s), jnp.stack(b2s),
            _pad_to(head["w1"], (d, d)).astype(jnp.bfloat16),
            _pad_to(head["b1"], (1, d)),
            _pad_to(head["w2"], (d, d)).astype(jnp.bfloat16),
            _pad_to(head["b2"], (1, d)))


def gin_forward_pallas(x, a_hat, pool_mat, layers, head, *, num_graphs, out_dim):
    n, f_in = x.shape
    hidden = layers[0]["w1"].shape[1]
    num_layers = len(layers)
    n_pad = _round_up(n, SUBLANE_BF16)            # bf16 sublane dim -> multiple of 16
    b_pad = _round_up(num_graphs, SUBLANE_BF16)
    d = _round_up(max(f_in, hidden, out_dim), LANE)

    a_bf = _pad_to(a_hat, (n_pad, n_pad)).astype(jnp.bfloat16)   # exact small ints
    x_pad = _pad_to(x, (n_pad, d)).astype(jnp.bfloat16)
    p_pad = _pad_to(pool_mat, (b_pad, n_pad)).astype(jnp.bfloat16)  # one-hot -> exact
    w1s, b1s, w2s, b2s, hw1, hb1, hw2, hb2 = prepare_kernel_params(layers, head, d)

    args = (a_bf, x_pad, w1s, b1s, w2s, b2s, p_pad, hw1, hb1, hw2, hb2)

    # Explicit scoped-VMEM budget: operands + output + intermediate headroom (capped).
    out_bytes = b_pad * d * 4
    scratch_est = 6 * n_pad * d * 4                       # agg / h / layer temporaries
    needed = sum(_nbytes(a) for a in args) + out_bytes + scratch_est
    vmem_limit = int(min(max(2 * needed, 32 << 20), 100 << 20))

    # Advisory cost for XLA scheduling of surrounding HLO.
    flops = (2 * num_layers * (n_pad * n_pad * d + 2 * n_pad * d * d)
             + 2 * b_pad * n_pad * d + 2 * 2 * b_pad * d * d)
    cost = pl.CostEstimate(flops=flops, transcendentals=0,
                           bytes_accessed=sum(_nbytes(a) for a in args) + out_bytes)

    vmem_spec = pl.BlockSpec(memory_space=pltpu.MemorySpace.VMEM)
    out = pl.pallas_call(
        functools.partial(_gin_fused_kernel, num_layers=num_layers),
        out_shape=jax.ShapeDtypeStruct((b_pad, d), jnp.float32),
        in_specs=[vmem_spec] * len(args),               # whole arrays, single-buffered VMEM
        out_specs=vmem_spec,
        compiler_params=pltpu.CompilerParams(vmem_limit_bytes=vmem_limit),
        cost_estimate=cost,
    )(*args)
    return out[:num_graphs, :out_dim]


# ----------------------------------------------------------------------------
# Parameter / graph construction (deterministic, in-script)
# ----------------------------------------------------------------------------
def init_params(key, num_input_features, num_layers, hidden_dim, out_dim):
    # NOTE: mirrors the PyTorch module -- it always builds first + (num_layers-2) + last,
    # i.e. at least 2 GINConv layers even if num_layers == 1.
    layers = []
    dims = [(num_input_features, hidden_dim, hidden_dim)]
    for _ in range(num_layers - 2):
        dims.append((hidden_dim, hidden_dim, hidden_dim))
    dims.append((hidden_dim, hidden_dim, out_dim))

    for (f_in, f_mid, f_out) in dims:
        key, k1, k2, k3, k4, k5, k6 = jax.random.split(key, 7)
        layers.append(dict(
            w1=0.1 * jax.random.normal(k1, (f_in, f_mid), jnp.float32),
            b1=0.1 * jax.random.normal(k2, (1, f_mid), jnp.float32),
            gamma=1.0 + 0.05 * jax.random.normal(k3, (1, f_mid), jnp.float32),
            beta=0.05 * jax.random.normal(k4, (1, f_mid), jnp.float32),
            mean=jnp.zeros((1, f_mid), jnp.float32),   # BN running_mean default
            var=jnp.ones((1, f_mid), jnp.float32),     # BN running_var default
            w2=0.1 * jax.random.normal(k5, (f_mid, f_out), jnp.float32),
            b2=0.1 * jax.random.normal(k6, (1, f_out), jnp.float32),
        ))

    key, k1, k2, k3, k4 = jax.random.split(key, 5)
    head = dict(
        w1=0.1 * jax.random.normal(k1, (out_dim, out_dim), jnp.float32),
        b1=0.1 * jax.random.normal(k2, (1, out_dim), jnp.float32),
        w2=0.1 * jax.random.normal(k3, (out_dim, out_dim), jnp.float32),
        b2=0.1 * jax.random.normal(k4, (1, out_dim), jnp.float32),
    )
    return layers, head


def build_graph_mats(edge_index, batch, num_nodes, num_graphs, eps=0.0):
    src, dst = edge_index[0], edge_index[1]
    a = jnp.zeros((num_nodes, num_nodes), jnp.float32).at[dst, src].add(1.0)
    a_hat = a + (1.0 + eps) * jnp.eye(num_nodes, dtype=jnp.float32)
    p = jnp.zeros((num_graphs, num_nodes), jnp.float32).at[batch, jnp.arange(num_nodes)].set(1.0)
    return a_hat, p


# ----------------------------------------------------------------------------
# Pure-JAX references
# ----------------------------------------------------------------------------
def gin_forward_ref_f32(x, a_hat, pool_mat, layers, head):
    # Exact eval-mode module semantics, all f32.
    for lp in layers:
        h = a_hat @ x
        h = h @ lp["w1"] + lp["b1"]
        h = (h - lp["mean"]) / jnp.sqrt(lp["var"] + BN_EPS) * lp["gamma"] + lp["beta"]
        h = jnp.maximum(h, 0.0)
        h = h @ lp["w2"] + lp["b2"]
        x = jnp.maximum(h, 0.0)
    pooled = pool_mat @ x
    h = jnp.maximum(pooled @ head["w1"] + head["b1"], 0.0)
    return h @ head["w2"] + head["b2"]


def gin_forward_ref_mixed(x, a_hat, pool_mat, layers, head):
    # Mirrors the kernel numerics exactly: BN folded, bf16 weights/activations,
    # f32 accumulation, f32 bias-add/ReLU, layer-boundary bf16 cast.
    a_bf = a_hat.astype(jnp.bfloat16)
    xb = x.astype(jnp.bfloat16)
    for lp in layers:
        w1f, b1f = fold_bn(lp["w1"], lp["b1"], lp["gamma"], lp["beta"],
                           lp["mean"], lp["var"])
        w1b = w1f.astype(jnp.bfloat16)
        w2b = lp["w2"].astype(jnp.bfloat16)
        agg = jnp.dot(a_bf, xb, preferred_element_type=jnp.float32)
        h = jnp.dot(agg.astype(jnp.bfloat16), w1b, preferred_element_type=jnp.float32) + b1f
        h = jnp.maximum(h, 0.0)
        h = jnp.dot(h.astype(jnp.bfloat16), w2b, preferred_element_type=jnp.float32) + lp["b2"]
        xb = jnp.maximum(h, 0.0).astype(jnp.bfloat16)
    pooled = jnp.dot(pool_mat.astype(jnp.bfloat16), xb, preferred_element_type=jnp.float32)
    h = jnp.dot(pooled.astype(jnp.bfloat16), head["w1"].astype(jnp.bfloat16),
                preferred_element_type=jnp.float32) + head["b1"]
    h = jnp.maximum(h, 0.0)
    return jnp.dot(h.astype(jnp.bfloat16), head["w2"].astype(jnp.bfloat16),
                   preferred_element_type=jnp.float32) + head["b2"]


if __name__ == "__main__":
    # Small, deterministic problem
    num_nodes = 16
    num_input_features = 16
    hidden_dim = 32
    out_dim = 32
    num_layers = 3
    num_graphs = 2
    num_edges = 48

    key = jax.random.PRNGKey(0)
    key, kx, ke = jax.random.split(key, 3)

    x = jax.random.normal(kx, (num_nodes, num_input_features), jnp.float32)
    src = jax.random.randint(ke, (num_edges,), 0, num_nodes)
    dst = jax.random.randint(jax.random.fold_in(ke, 1), (num_edges,), 0, num_nodes)
    edge_index = jnp.stack([src, dst], axis=0)
    batch = jnp.concatenate([jnp.zeros(num_nodes // 2, jnp.int32),
                             jnp.ones(num_nodes - num_nodes // 2, jnp.int32)])

    a_hat, pool_mat = build_graph_mats(edge_index, batch, num_nodes, num_graphs)
    # Host-side data validation (outside the builder / any jit): bf16 exactness of A_hat
    # requires integer edge multiplicities <= 256 and GINConv eps == 0.
    assert float(jnp.max(a_hat)) <= 256.0, "edge multiplicity too large for exact bf16"

    layers, head = init_params(key, num_input_features, num_layers, hidden_dim, out_dim)

    pred = gin_forward_pallas(x, a_hat, pool_mat, layers, head,
                              num_graphs=num_graphs, out_dim=out_dim)
    pred = jax.block_until_ready(pred)

    ref_mixed = gin_forward_ref_mixed(x, a_hat, pool_mat, layers, head)
    ref_f32 = gin_forward_ref_f32(x, a_hat, pool_mat, layers, head)

    assert pred.shape == (num_graphs, out_dim)
    assert jnp.allclose(pred, ref_mixed, atol=2e-3, rtol=2e-3), "mismatch vs bf16 mixed reference"
    # bf16 weights + activations introduce ~0.2% per-dot quantization; compare loosely vs pure f32.
    assert jnp.allclose(pred, ref_f32, atol=8e-2, rtol=8e-2), "mismatch vs f32 module reference"

    print("KERNEL_OK")
</pallas_src>

<mosaic_0001>
module attributes {stable_mosaic.version = 11 : i64} {
  func.func @_gin_fused_kernel(%arg0: memref<16x16xbf16, #tpu.memory_space<vmem>>, %arg1: memref<16x128xbf16, #tpu.memory_space<vmem>>, %arg2: memref<3x128x128xbf16, #tpu.memory_space<vmem>>, %arg3: memref<3x1x128xf32, #tpu.memory_space<vmem>>, %arg4: memref<3x128x128xbf16, #tpu.memory_space<vmem>>, %arg5: memref<3x1x128xf32, #tpu.memory_space<vmem>>, %arg6: memref<16x16xbf16, #tpu.memory_space<vmem>>, %arg7: memref<128x128xbf16, #tpu.memory_space<vmem>>, %arg8: memref<1x128xf32, #tpu.memory_space<vmem>>, %arg9: memref<128x128xbf16, #tpu.memory_space<vmem>>, %arg10: memref<1x128xf32, #tpu.memory_space<vmem>>, %arg11: memref<16x128xf32, #tpu.memory_space<vmem>>) attributes {dimension_semantics = [], scalar_prefetch = 0 : i64, scratch_operands = 0 : i64, tpu.core_type = #tpu.core_type<tc>} {
    %c0 = arith.constant 0 : index
    %c0_0 = arith.constant 0 : index
    %0 = vector.load %arg0[%c0, %c0_0] : memref<16x16xbf16, #tpu.memory_space<vmem>>, vector<16x16xbf16>
    %c0_1 = arith.constant 0 : index
    %c0_2 = arith.constant 0 : index
    %1 = vector.load %arg1[%c0_1, %c0_2] : memref<16x128xbf16, #tpu.memory_space<vmem>>, vector<16x128xbf16>
    %cst = arith.constant dense<0.000000e+00> : vector<16x128xf32>
    %2 = tpu.matmul %0, %1, %cst {dimension_numbers = #tpu.dot_dimension_numbers<[1], [0], [0], [1], [0, 0, 1, 1], [], []>} : vector<16x16xbf16>, vector<16x128xbf16>, vector<16x128xf32> -> vector<16x128xf32>
    %3 = arith.truncf %2 : vector<16x128xf32> to vector<16x128xbf16>
    %c0_3 = arith.constant 0 : index
    %c0_4 = arith.constant 0 : index
    %c0_5 = arith.constant 0 : index
    %4 = vector.load %arg2[%c0_3, %c0_4, %c0_5] : memref<3x128x128xbf16, #tpu.memory_space<vmem>>, vector<1x128x128xbf16>
    %5 = vector.shape_cast %4 : vector<1x128x128xbf16> to vector<128x128xbf16>
    %cst_6 = arith.constant dense<0.000000e+00> : vector<16x128xf32>
    %6 = tpu.matmul %3, %5, %cst_6 {dimension_numbers = #tpu.dot_dimension_numbers<[1], [0], [0], [1], [0, 0, 1, 1], [], []>} : vector<16x128xbf16>, vector<128x128xbf16>, vector<16x128xf32> -> vector<16x128xf32>
    %c0_7 = arith.constant 0 : index
    %c0_8 = arith.constant 0 : index
    %c0_9 = arith.constant 0 : index
    %7 = vector.load %arg3[%c0_7, %c0_8, %c0_9] : memref<3x1x128xf32, #tpu.memory_space<vmem>>, vector<1x1x128xf32>
    %8 = vector.shape_cast %7 : vector<1x1x128xf32> to vector<1x128xf32>
    %9 = vector.broadcast %8 : vector<1x128xf32> to vector<16x128xf32>
    %10 = arith.addf %6, %9 : vector<16x128xf32>
    %cst_10 = arith.constant 0.000000e+00 : f32
    %11 = vector.broadcast %cst_10 : f32 to vector<16x128xf32>
    %12 = arith.maximumf %10, %11 : vector<16x128xf32>
    %13 = arith.truncf %12 : vector<16x128xf32> to vector<16x128xbf16>
    %c0_11 = arith.constant 0 : index
    %c0_12 = arith.constant 0 : index
    %c0_13 = arith.constant 0 : index
    %14 = vector.load %arg4[%c0_11, %c0_12, %c0_13] : memref<3x128x128xbf16, #tpu.memory_space<vmem>>, vector<1x128x128xbf16>
    %15 = vector.shape_cast %14 : vector<1x128x128xbf16> to vector<128x128xbf16>
    %cst_14 = arith.constant dense<0.000000e+00> : vector<16x128xf32>
    %16 = tpu.matmul %13, %15, %cst_14 {dimension_numbers = #tpu.dot_dimension_numbers<[1], [0], [0], [1], [0, 0, 1, 1], [], []>} : vector<16x128xbf16>, vector<128x128xbf16>, vector<16x128xf32> -> vector<16x128xf32>
    %c0_15 = arith.constant 0 : index
    %c0_16 = arith.constant 0 : index
    %c0_17 = arith.constant 0 : index
    %17 = vector.load %arg5[%c0_15, %c0_16, %c0_17] : memref<3x1x128xf32, #tpu.memory_space<vmem>>, vector<1x1x128xf32>
    %18 = vector.shape_cast %17 : vector<1x1x128xf32> to vector<1x128xf32>
    %19 = vector.broadcast %18 : vector<1x128xf32> to vector<16x128xf32>
    %20 = arith.addf %16, %19 : vector<16x128xf32>
    %cst_18 = arith.constant 0.000000e+00 : f32
    %21 = vector.broadcast %cst_18 : f32 to vector<16x128xf32>
    %22 = arith.maximumf %20, %21 : vector<16x128xf32>
    %23 = arith.truncf %22 : vector<16x128xf32> to vector<16x128xbf16>
    %cst_19 = arith.constant dense<0.000000e+00> : vector<16x128xf32>
    %24 = tpu.matmul %0, %23, %cst_19 {dimension_numbers = #tpu.dot_dimension_numbers<[1], [0], [0], [1], [0, 0, 1, 1], [], []>} : vector<16x16xbf16>, vector<16x128xbf16>, vector<16x128xf32> -> vector<16x128xf32>
    %25 = arith.truncf %24 : vector<16x128xf32> to vector<16x128xbf16>
    %c1 = arith.constant 1 : index
    %c0_20 = arith.constant 0 : index
    %c0_21 = arith.constant 0 : index
    %26 = vector.load %arg2[%c1, %c0_20, %c0_21] : memref<3x128x128xbf16, #tpu.memory_space<vmem>>, vector<1x128x128xbf16>
    %27 = vector.shape_cast %26 : vector<1x128x128xbf16> to vector<128x128xbf16>
    %cst_22 = arith.constant dense<0.000000e+00> : vector<16x128xf32>
    %28 = tpu.matmul %25, %27, %cst_22 {dimension_numbers = #tpu.dot_dimension_numbers<[1], [0], [0], [1], [0, 0, 1, 1], [], []>} : vector<16x128xbf16>, vector<128x128xbf16>, vector<16x128xf32> -> vector<16x128xf32>
    %c1_23 = arith.constant 1 : index
    %c0_24 = arith.constant 0 : index
    %c0_25 = arith.constant 0 : index
    %29 = vector.load %arg3[%c1_23, %c0_24, %c0_25] : memref<3x1x128xf32, #tpu.memory_space<vmem>>, vector<1x1x128xf32>
    %30 = vector.shape_cast %29 : vector<1x1x128xf32> to vector<1x128xf32>
    %31 = vector.broadcast %30 : vector<1x128xf32> to vector<16x128xf32>
    %32 = arith.addf %28, %31 : vector<16x128xf32>
    %cst_26 = arith.constant 0.000000e+00 : f32
    %33 = vector.broadcast %cst_26 : f32 to vector<16x128xf32>
    %34 = arith.maximumf %32, %33 : vector<16x128xf32>
    %35 = arith.truncf %34 : vector<16x128xf32> to vector<16x128xbf16>
    %c1_27 = arith.constant 1 : index
    %c0_28 = arith.constant 0 : index
    %c0_29 = arith.constant 0 : index
    %36 = vector.load %arg4[%c1_27, %c0_28, %c0_29] : memref<3x128x128xbf16, #tpu.memory_space<vmem>>, vector<1x128x128xbf16>
    %37 = vector.shape_cast %36 : vector<1x128x128xbf16> to vector<128x128xbf16>
    %cst_30 = arith.constant dense<0.000000e+00> : vector<16x128xf32>
    %38 = tpu.matmul %35, %37, %cst_30 {dimension_numbers = #tpu.dot_dimension_numbers<[1], [0], [0], [1], [0, 0, 1, 1], [], []>} : vector<16x128xbf16>, vector<128x128xbf16>, vector<16x128xf32> -> vector<16x128xf32>
    %c1_31 = arith.constant 1 : index
    %c0_32 = arith.constant 0 : index
    %c0_33 = arith.constant 0 : index
    %39 = vector.load %arg5[%c1_31, %c0_32, %c0_33] : memref<3x1x128xf32, #tpu.memory_space<vmem>>, vector<1x1x128xf32>
    %40 = vector.shape_cast %39 : vector<1x1x128xf32> to vector<1x128xf32>
    %41 = vector.broadcast %40 : vector<1x128xf32> to vector<16x128xf32>
    %42 = arith.addf %38, %41 : vector<16x128xf32>
    %cst_34 = arith.constant 0.000000e+00 : f32
    %43 = vector.broadcast %cst_34 : f32 to vector<16x128xf32>
    %44 = arith.maximumf %42, %43 : vector<16x128xf32>
    %45 = arith.truncf %44 : vector<16x128xf32> to vector<16x128xbf16>
    %cst_35 = arith.constant dense<0.000000e+00> : vector<16x128xf32>
    %46 = tpu.matmul %0, %45, %cst_35 {dimension_numbers = #tpu.dot_dimension_numbers<[1], [0], [0], [1], [0, 0, 1, 1], [], []>} : vector<16x16xbf16>, vector<16x128xbf16>, vector<16x128xf32> -> vector<16x128xf32>
    %47 = arith.truncf %46 : vector<16x128xf32> to vector<16x128xbf16>
    %c2 = arith.constant 2 : index
    %c0_36 = arith.constant 0 : index
    %c0_37 = arith.constant 0 : index
    %48 = vector.load %arg2[%c2, %c0_36, %c0_37] : memref<3x128x128xbf16, #tpu.memory_space<vmem>>, vector<1x128x128xbf16>
    %49 = vector.shape_cast %48 : vector<1x128x128xbf16> to vector<128x128xbf16>
    %cst_38 = arith.constant dense<0.000000e+00> : vector<16x128xf32>
    %50 = tpu.matmul %47, %49, %cst_38 {dimension_numbers = #tpu.dot_dimension_numbers<[1], [0], [0], [1], [0, 0, 1, 1], [], []>} : vector<16x128xbf16>, vector<128x128xbf16>, vector<16x128xf32> -> vector<16x128xf32>
    %c2_39 = arith.constant 2 : index
    %c0_40 = arith.constant 0 : index
    %c0_41 = arith.constant 0 : index
    %51 = vector.load %arg3[%c2_39, %c0_40, %c0_41] : memref<3x1x128xf32, #tpu.memory_space<vmem>>, vector<1x1x128xf32>
    %52 = vector.shape_cast %51 : vector<1x1x128xf32> to vector<1x128xf32>
    %53 = vector.broadcast %52 : vector<1x128xf32> to vector<16x128xf32>
    %54 = arith.addf %50, %53 : vector<16x128xf32>
    %cst_42 = arith.constant 0.000000e+00 : f32
    %55 = vector.broadcast %cst_42 : f32 to vector<16x128xf32>
    %56 = arith.maximumf %54, %55 : vector<16x128xf32>
    %57 = arith.truncf %56 : vector<16x128xf32> to vector<16x128xbf16>
    %c2_43 = arith.constant 2 : index
    %c0_44 = arith.constant 0 : index
    %c0_45 = arith.constant 0 : index
    %58 = vector.load %arg4[%c2_43, %c0_44, %c0_45] : memref<3x128x128xbf16, #tpu.memory_space<vmem>>, vector<1x128x128xbf16>
    %59 = vector.shape_cast %58 : vector<1x128x128xbf16> to vector<128x128xbf16>
    %cst_46 = arith.constant dense<0.000000e+00> : vector<16x128xf32>
    %60 = tpu.matmul %57, %59, %cst_46 {dimension_numbers = #tpu.dot_dimension_numbers<[1], [0], [0], [1], [0, 0, 1, 1], [], []>} : vector<16x128xbf16>, vector<128x128xbf16>, vector<16x128xf32> -> vector<16x128xf32>
    %c2_47 = arith.constant 2 : index
    %c0_48 = arith.constant 0 : index
    %c0_49 = arith.constant 0 : index
    %61 = vector.load %arg5[%c2_47, %c0_48, %c0_49] : memref<3x1x128xf32, #tpu.memory_space<vmem>>, vector<1x1x128xf32>
    %62 = vector.shape_cast %61 : vector<1x1x128xf32> to vector<1x128xf32>
    %63 = vector.broadcast %62 : vector<1x128xf32> to vector<16x128xf32>
    %64 = arith.addf %60, %63 : vector<16x128xf32>
    %cst_50 = arith.constant 0.000000e+00 : f32
    %65 = vector.broadcast %cst_50 : f32 to vector<16x128xf32>
    %66 = arith.maximumf %64, %65 : vector<16x128xf32>
    %67 = arith.truncf %66 : vector<16x128xf32> to vector<16x128xbf16>
    %c0_51 = arith.constant 0 : index
    %c0_52 = arith.constant 0 : index
    %68 = vector.load %arg6[%c0_51, %c0_52] : memref<16x16xbf16, #tpu.memory_space<vmem>>, vector<16x16xbf16>
    %cst_53 = arith.constant dense<0.000000e+00> : vector<16x128xf32>
    %69 = tpu.matmul %68, %67, %cst_53 {dimension_numbers = #tpu.dot_dimension_numbers<[1], [0], [0], [1], [0, 0, 1, 1], [], []>} : vector<16x16xbf16>, vector<16x128xbf16>, vector<16x128xf32> -> vector<16x128xf32>
    %70 = arith.truncf %69 : vector<16x128xf32> to vector<16x128xbf16>
    %c0_54 = arith.constant 0 : index
    %c0_55 = arith.constant 0 : index
    %71 = vector.load %arg7[%c0_54, %c0_55] : memref<128x128xbf16, #tpu.memory_space<vmem>>, vector<128x128xbf16>
    %cst_56 = arith.constant dense<0.000000e+00> : vector<16x128xf32>
    %72 = tpu.matmul %70, %71, %cst_56 {dimension_numbers = #tpu.dot_dimension_numbers<[1], [0], [0], [1], [0, 0, 1, 1], [], []>} : vector<16x128xbf16>, vector<128x128xbf16>, vector<16x128xf32> -> vector<16x128xf32>
    %c0_57 = arith.constant 0 : index
    %c0_58 = arith.constant 0 : index
    %73 = vector.load %arg8[%c0_57, %c0_58] : memref<1x128xf32, #tpu.memory_space<vmem>>, vector<1x128xf32>
    %74 = vector.broadcast %73 : vector<1x128xf32> to vector<16x128xf32>
    %75 = arith.addf %72, %74 : vector<16x128xf32>
    %cst_59 = arith.constant 0.000000e+00 : f32
    %76 = vector.broadcast %cst_59 : f32 to vector<16x128xf32>
    %77 = arith.maximumf %75, %76 : vector<16x128xf32>
    %78 = arith.truncf %77 : vector<16x128xf32> to vector<16x128xbf16>
    %c0_60 = arith.constant 0 : index
    %c0_61 = arith.constant 0 : index
    %79 = vector.load %arg9[%c0_60, %c0_61] : memref<128x128xbf16, #tpu.memory_space<vmem>>, vector<128x128xbf16>
    %cst_62 = arith.constant dense<0.000000e+00> : vector<16x128xf32>
    %80 = tpu.matmul %78, %79, %cst_62 {dimension_numbers = #tpu.dot_dimension_numbers<[1], [0], [0], [1], [0, 0, 1, 1], [], []>} : vector<16x128xbf16>, vector<128x128xbf16>, vector<16x128xf32> -> vector<16x128xf32>
    %c0_63 = arith.constant 0 : index
    %c0_64 = arith.constant 0 : index
    %81 = vector.load %arg10[%c0_63, %c0_64] : memref<1x128xf32, #tpu.memory_space<vmem>>, vector<1x128xf32>
    %82 = vector.broadcast %81 : vector<1x128xf32> to vector<16x128xf32>
    %83 = arith.addf %80, %82 : vector<16x128xf32>
    %c0_65 = arith.constant 0 : index
    %c0_66 = arith.constant 0 : index
    %84 = vector.load %arg11[%c0_65, %c0_66] : memref<16x128xf32, #tpu.memory_space<vmem>>, vector<16x128xf32>
    tpu.vector_store %arg11[%c0_65, %c0_66], %83 {strides = array<i32>} : memref<16x128xf32, #tpu.memory_space<vmem>>, vector<16x128xf32>,
    return
  }
}

</mosaic_0001>

<bundles_post_ra>
// kernel: tpu_custom_call.1
= control target key start
LH: loop header
LB: loop body
LE: loop exit
PB: predicated region body
PF: predicated region fallthrough
CT: control target
= control target key end

     0   :  { %16 = vsyncpa [#allocation3], 0  ;;  %s2181_s0 = inlined_call_operand.hbm [shape: bf16[16,16], index: 0, kind: input, shape index: {}]   ;;  %s2182_s1 = inlined_call_operand.hbm [shape: bf16[16,128], index: 1, kind: input, shape index: {}]   ;;  %s2183_s2 = inlined_call_operand.hbm [shape: bf16[3,128,128], index: 2, kind: input, shape index: {}]   ;;  %s2184_s3 = inlined_call_operand.vmem [shape: f32[3,1,128], index: 3, kind: input, shape index: {}]   ;;  %s2185_s4 = inlined_call_operand.hbm [shape: bf16[3,128,128], index: 4, kind: input, shape index: {}]   ;;  %s2186_s5 = inlined_call_operand.vmem [shape: f32[3,1,128], index: 5, kind: input, shape index: {}]   ;;  %s2187_s6 = inlined_call_operand.vmem [shape: bf16[16,16], index: 6, kind: input, shape index: {}]   ;;  %s2188_s7 = inlined_call_operand.hbm [shape: bf16[128,128], index: 7, kind: input, shape index: {}]   ;;  %s2189_s8 = inlined_call_operand.vmem [shape: f32[1,128], index: 8, kind: input, shape index: {}]   ;;  %s2190_s9 = inlined_call_operand.hbm [shape: bf16[128,128], index: 9, kind: input, shape index: {}]   ;;  %s2191_s10 = inlined_call_operand.vmem [shape: f32[1,128], index: 10, kind: input, shape index: {}]   ;;  %s2192_s11 = inlined_call_operand.hbm [shape: f32[16,128], index: 11, kind: output, shape index: {}]  }
   0x1   :  { %17 = vsyncpa [#allocation6], 0 }
   0x2   :  { %18 = vsyncpa [#allocation9], 0 }
   0x3   :  { %19 = vsyncpa [#allocation12], 0 }
   0x4   :  { %20 = vsyncpa [#allocation4], 0  ;;  %s1857_s17 = smov [#allocation5]   ;;  %s1858_s19 = smov [#allocation8]  }
   0x5   :  { %s38_s18 = sshll.u32 %s1857_s17, 4  ;;  %s64_s20 = sshll.u32 %s1858_s19, 4  ;;  %s39_s18 = int_to_ptr.vmem [resolvable:$true] %s38_s18  ;;  %s1930_s20 = int_to_ptr.vmem [resolvable:$true] %s64_s20 }
   0x6   :  { %s1693_s23 = scalar_lea.hbm %s2182_s1, 128 }
   0x7   :  { %p1694_p0 = scmp.ne.s32.totalorder %s2182_s1, %s1693_s23  ;;  %p1697_p1 = scmp.lt.u32.totalorder %s1693_s23, %s2182_s1 }
   0x9   :  { %p1699_p2 = pnand %p1697_p1, %p1694_p0 }
   0xb   :  { %1702 = shalt.err (!%p1699_p2)
}
   0xc   :  { %s1703_s28 = scalar_lea.vmem %s39_s18, 128  ;;  %p1708_p4 = scmp.lt.s32.totalorder %s39_s18, %s39_s18 }
   0xd   :  { %p1704_p3 = scmp.ne.s32.totalorder %s39_s18, %s1703_s28  ;;  %p1709_p5 = scmp.lt.s32.totalorder %s1703_s28, %s1703_s28 }
   0xf   :  { %p1710_p6 = por %p1709_p5, %p1708_p4 }
  0x11   :  { %p1711_p7 = pnand %p1710_p6, %p1704_p3 }
  0x13   :  { %1714 = shalt.err (!%p1711_p7)
}
  0x14   :  { %s1859_s29 = smov 64   ;;  %s1860_s30 = smov 4  }
  0x15   :  { %44 = dma.hbm_to_vmem [thread:$0]  %s2182_s1, 128, %s39_s18, [#allocation6], %s1859_s29, %s1859_s29, %s1860_s30  }
  0x16   :  { %s1715_s16 = scalar_lea.hbm %s2185_s4, 3072 }
  0x17   :  { %p1716_p8 = scmp.ne.s32.totalorder %s2185_s4, %s1715_s16  ;;  %p1719_p9 = scmp.lt.u32.totalorder %s1715_s16, %s2185_s4 }
  0x19   :  { %p1721_p10 = pnand %p1719_p9, %p1716_p8 }
  0x1b   :  { %1724 = shalt.err (!%p1721_p10)
}
  0x1c   :  { %s1725_s23 = scalar_lea.vmem %s1930_s20, 3072  ;;  %p1730_p12 = scmp.lt.s32.totalorder %s1930_s20, %s1930_s20 }
  0x1d   :  { %p1726_p11 = scmp.ne.s32.totalorder %s1930_s20, %s1725_s23  ;;  %p1731_p13 = scmp.lt.s32.totalorder %s1725_s23, %s1725_s23 }
  0x1f   :  { %p1732_p0 = por %p1731_p13, %p1730_p12 }
  0x21   :  { %p1733_p1 = pnand %p1732_p0, %p1726_p11 }
  0x23   :  { %1736 = shalt.err (!%p1733_p1)
}
  0x24   :  { %70 = dma.hbm_to_vmem [thread:$0]  %s2185_s4, 3072, %s1930_s20, [#allocation9], %s1859_s29, %s1859_s29, %s1860_s30  }
  0x25   :  { %s1861_s24 = smov [#allocation2]   ;;  %s1862_s26 = smov [#allocation7]  }
  0x26   :  { %s26_s25 = sshll.u32 %s1861_s24, 4  ;;  %s50_s27 = sshll.u32 %s1862_s26, 4  ;;  %s27_s25 = int_to_ptr.vmem [resolvable:$true] %s26_s25  ;;  %s1967_s27 = int_to_ptr.vmem [resolvable:$true] %s50_s27 }
  0x27   :  { %s1737_s13 = scalar_lea.hbm %s2181_s0, 128 }
  0x28   :  { %p1738_p2 = scmp.ne.s32.totalorder %s2181_s0, %s1737_s13  ;;  %p1741_p3 = scmp.lt.u32.totalorder %s1737_s13, %s2181_s0 }
  0x2a   :  { %p1743_p4 = pnand %p1741_p3, %p1738_p2 }
  0x2c   :  { %1746 = shalt.err (!%p1743_p4)
}
  0x2d   :  { %s1747_s4 = scalar_lea.vmem %s27_s25, 128  ;;  %p1752_p6 = scmp.lt.s32.totalorder %s27_s25, %s27_s25 }
  0x2e   :  { %p1748_p5 = scmp.ne.s32.totalorder %s27_s25, %s1747_s4  ;;  %p1753_p7 = scmp.lt.s32.totalorder %s1747_s4, %s1747_s4 }
  0x30   :  { %p1754_p8 = por %p1753_p7, %p1752_p6 }
  0x32   :  { %p1755_p9 = pnand %p1754_p8, %p1748_p5 }
  0x34   :  { %1758 = shalt.err (!%p1755_p9)
}
  0x35   :  { %32 = dma.hbm_to_vmem [thread:$0]  %s2181_s0, 128, %s27_s25, [#allocation3], %s1859_s29, %s1859_s29, %s1860_s30  }
  0x36   :  { %s1759_s23 = scalar_lea.hbm %s2183_s2, 3072 }
  0x37   :  { %p1760_p10 = scmp.ne.s32.totalorder %s2183_s2, %s1759_s23  ;;  %p1763_p11 = scmp.lt.u32.totalorder %s1759_s23, %s2183_s2 }
  0x39   :  { %p1765_p12 = pnand %p1763_p11, %p1760_p10 }
  0x3b   :  { %1768 = shalt.err (!%p1765_p12)
}
  0x3c   :  { %s1769_s28 = scalar_lea.vmem %s1967_s27, 3072  ;;  %p1774_p0 = scmp.lt.s32.totalorder %s1967_s27, %s1967_s27 }
  0x3d   :  { %p1770_p13 = scmp.ne.s32.totalorder %s1967_s27, %s1769_s28  ;;  %p1775_p1 = scmp.lt.s32.totalorder %s1769_s28, %s1769_s28 }
  0x3f   :  { %p1776_p2 = por %p1775_p1, %p1774_p0 }
  0x41   :  { %p1777_p3 = pnand %p1776_p2, %p1770_p13 }
  0x43   :  { %1780 = shalt.err (!%p1777_p3)
}
  0x44   :  { %56 = dma.hbm_to_vmem [thread:$0]  %s2183_s2, 3072, %s1967_s27, [#allocation6], %s1859_s29, %s1859_s29, %s1860_s30  }
  0x45   :  { %s1863_s12 = smov [#allocation10]   ;;  %s1864_s14 = smov [#allocation11]  }
  0x46   :  { %s80_s13 = sshll.u32 %s1863_s12, 4  ;;  %s94_s15 = sshll.u32 %s1864_s14, 4  ;;  %s81_s13 = int_to_ptr.vmem [resolvable:$true] %s80_s13  ;;  %s2004_s15 = int_to_ptr.vmem [resolvable:$true] %s94_s15 }
  0x47   :  { %s1781_s4 = scalar_lea.hbm %s2188_s7, 1024 }
  0x48   :  { %p1782_p4 = scmp.ne.s32.totalorder %s2188_s7, %s1781_s4  ;;  %p1785_p5 = scmp.lt.u32.totalorder %s1781_s4, %s2188_s7 }
  0x4a   :  { %p1787_p6 = pnand %p1785_p5, %p1782_p4 }
  0x4c   :  { %1790 = shalt.err (!%p1787_p6)
}
  0x4d   :  { %s1791_s2 = scalar_lea.vmem %s81_s13, 1024  ;;  %p1796_p8 = scmp.lt.s32.totalorder %s81_s13, %s81_s13 }
  0x4e   :  { %p1792_p7 = scmp.ne.s32.totalorder %s81_s13, %s1791_s2  ;;  %p1797_p9 = scmp.lt.s32.totalorder %s1791_s2, %s1791_s2 }
  0x50   :  { %p1798_p10 = por %p1797_p9, %p1796_p8 }
  0x52   :  { %p1799_p11 = pnand %p1798_p10, %p1792_p7 }
  0x54   :  { %1802 = shalt.err (!%p1799_p11)
}
  0x55   :  { %86 = dma.hbm_to_vmem [thread:$0]  %s2188_s7, 1024, %s81_s13, [#allocation9], %s1859_s29, %s1859_s29, %s1860_s30  }
  0x56   :  { %s1803_s24 = scalar_lea.hbm %s2190_s9, 1024 }
  0x57   :  { %p1804_p12 = scmp.ne.s32.totalorder %s2190_s9, %s1803_s24  ;;  %p1807_p13 = scmp.lt.u32.totalorder %s1803_s24, %s2190_s9 }
  0x59   :  { %p1809_p0 = pnand %p1807_p13, %p1804_p12 }
  0x5b   :  { %1812 = shalt.err (!%p1809_p0)
}
  0x5c   :  { %s1813_s12 = scalar_lea.vmem %s2004_s15, 1024  ;;  %p1818_p2 = scmp.lt.s32.totalorder %s2004_s15, %s2004_s15 }
  0x5d   :  { %p1814_p1 = scmp.ne.s32.totalorder %s2004_s15, %s1813_s12  ;;  %p1819_p3 = scmp.lt.s32.totalorder %s1813_s12, %s1813_s12 }
  0x5f   :  { %p1820_p4 = por %p1819_p3, %p1818_p2 }
  0x61   :  { %p1821_p5 = pnand %p1820_p4, %p1814_p1 }
  0x63   :  { %1824 = shalt.err (!%p1821_p5)
}
  0x64   :  { %100 = dma.hbm_to_vmem [thread:$0]  %s2190_s9, 1024, %s2004_s15, [#allocation12], %s1859_s29, %s1859_s29, %s1860_s30  }
  0x65   :  { %1847 = dma.done.wait [#allocation3], 128  }
  0x66   :  { %1848 = vsyncadd [#allocation3], 4294967168 }
  0x67   :  { %1849 = dma.done.wait [#allocation6], 3200  }
  0x68   :  { %1850 = vsyncadd [#allocation6], 4294964096 }
  0x69   :  { %1851 = dma.done.wait [#allocation9], 4096  }
  0x6a   :  { %1852 = vsyncadd [#allocation9], 4294963200 }
  0x6b   :  { %1853 = dma.done.wait [#allocation12], 1024  }
  0x6c   :  { %1854 = vsyncadd [#allocation12], 4294966272  ;;  %v1865_v0 = vmov 0.0   ;;  %vm1866_vm0 = vmmov 0   ;;  %v1626_v1 = vld [vmem:[#allocation5] sm:$0xff]   ;;  %v2047_v2 = vld [vmem:[#allocation2] sm:$0xff]  }
  0x6d   :  { %1429 = vmatprep.subr.bf16.mxu0 %v1865_v0  ;;  %1431 = vmatprep.mubr.msk.bf16.mxu0 %vm1866_vm0, %v1865_v0  ;;  %vm137_vm1 = vcmask 130048   ;;  %v1628_v3 = vld [vmem:[#allocation7] sm:$0xff]   ;;  %v1629_v4 = vld [vmem:[#allocation7 + $0x8] sm:$0xff]   ;;  %v1630_v5 = vld [vmem:[#allocation7 + $0x10] sm:$0xff]   ;;  %s1867_s1 = smov [#allocation13]  }
  0x6e   :  { %1435 = vmatprep.subr.bf16.mxu1 %v1865_v0  ;;  %1451 = vmatprep.mubr.msk.bf16.mxu1 %vm1866_vm0, %v1865_v0  ;;  %v1631_v6 = vld [vmem:[#allocation7 + $0x18] sm:$0xff]   ;;  %v1632_v7 = vld [vmem:[#allocation7 + $0x20] sm:$0xff]   ;;  %v1633_v8 = vld [vmem:[#allocation7 + $0x28] sm:$0xff]   ;;  %s1251_s18 = sshll.u32 %s1867_s1, 4  ;;  %s1252_s18 = int_to_ptr.vmem [resolvable:$true] %s1251_s18 }
  0x6f   :  { %1430 = vmatpush3.bf16.msra.mxu0 %v1626_v1  ;;  %1436 = vmatpush3.bf16.msra.mxu1 %v1628_v3  ;;  %v1634_v9 = vld [vmem:[#allocation7 + $0x30] sm:$0xff]   ;;  %v1635_v10 = vld [vmem:[#allocation7 + $0x38] sm:$0xff]   ;;  %v1636_v11 = vld [vmem:[#allocation8] sm:$0xff]   ;;  %p1830_p7 = scmp.lt.s32.totalorder %s1252_s18, %s1252_s18 }
  0x70   :  { %1455 = vmatprep.subr.bf16.mxu0 %v1865_v0  ;;  %1437 = vmatprep.subr.bf16.mxu1 %v1865_v0  ;;  %v1637_v12 = vld [vmem:[#allocation8 + $0x8] sm:$0xff]   ;;  %v1638_v13 = vld [vmem:[#allocation8 + $0x10] sm:$0xff]   ;;  %v1639_v14 = vld [vmem:[#allocation8 + $0x18] sm:$0xff]  }
  0x71   :  { %v1640_v15 = vld [vmem:[#allocation8 + $0x20] sm:$0xff]   ;;  %v1641_v16 = vld [vmem:[#allocation8 + $0x28] sm:$0xff]   ;;  %v1642_v22 = vld [vmem:[#allocation8 + $0x30] sm:$0xff]  }
  0x72   :  { %1432 = vmatmul.mubr.msk.bf16.vlgmr.msra.gmra.mrb[0].mxu0 %vm137_vm1, %v2047_v2  ;;  %v1643_v23 = vld [vmem:[#allocation8 + $0x38] sm:$0xff]   ;;  %v1269_v24 = vld [vmem:[%s2184_s3] ss:$0 sm:$0xff]  ;;  %v1644_v34 = vld [vmem:[#allocation7 + $0x40] sm:$0xff]  }
  0x73   :  { %1471 = vmatprep.mubr.msk.bf16.mxu0 %vm1866_vm0, %v1865_v0  ;;  %1438 = vmatpush3.bf16.msra.mxu1 %v1629_v4  ;;  %v1645_v35 = vld [vmem:[#allocation7 + $0x48] sm:$0xff]   ;;  %v1646_v36 = vld [vmem:[#allocation7 + $0x50] sm:$0xff]   ;;  %v1647_v37 = vld [vmem:[#allocation7 + $0x58] sm:$0xff]  }
  0x74   :  { %1439 = vmatprep.subr.bf16.mxu1 %v1865_v0  ;;  %1456 = vmatpush3.bf16.msra.mxu0 %v1636_v11  ;;  %v1648_v38 = vld [vmem:[#allocation7 + $0x60] sm:$0xff]   ;;  %v1649_v39 = vld [vmem:[#allocation7 + $0x68] sm:$0xff]   ;;  %v1650_v40 = vld [vmem:[#allocation7 + $0x70] sm:$0xff]  }
  0x75   :  { %1457 = vmatprep.subr.bf16.mxu0 %v1865_v0  ;;  %v1278_v41 = vld [vmem:[%s2186_s5] ss:$0 sm:$0xff]  ;;  %v1651_v51 = vld [vmem:[#allocation7 + $0x78] sm:$0xff]   ;;  %v1652_v52 = vld [vmem:[#allocation8 + $0x40] sm:$0xff]  }
  0x76   :  { %v1653_v53 = vld [vmem:[#allocation8 + $0x48] sm:$0xff]   ;;  %v1654_v54 = vld [vmem:[#allocation8 + $0x50] sm:$0xff]   ;;  %v1655_v55 = vld [vmem:[#allocation8 + $0x58] sm:$0xff]  }
  0x77   :  { %1440 = vmatpush3.bf16.msra.mxu1 %v1630_v5  ;;  %v1656_v56 = vld [vmem:[#allocation8 + $0x60] sm:$0xff]   ;;  %v1657_v57 = vld [vmem:[#allocation8 + $0x68] sm:$0xff]   ;;  %v1658_v63 = vld [vmem:[#allocation8 + $0x70] sm:$0xff]  }
  0x78   :  { %1441 = vmatprep.subr.bf16.mxu1 %v1865_v0  ;;  %1458 = vmatpush3.bf16.msra.mxu0 %v1637_v12  ;;  %v1659_v1 = vld [vmem:[#allocation8 + $0x78] sm:$0xff]   ;;  %v1289_v3 = vld [vmem:[%s2184_s3 + $0x1] ss:$0 sm:$0xff] }
  0x79   :  { %1459 = vmatprep.subr.bf16.mxu0 %v1865_v0 }
  0x7b   :  { %1442 = vmatpush3.bf16.msra.mxu1 %v1631_v6 }
  0x7c   :  { %1443 = vmatprep.subr.bf16.mxu1 %v1865_v0  ;;  %1460 = vmatpush3.bf16.msra.mxu0 %v1638_v13  ;;  %v1660_v13 = vld [vmem:[#allocation7 + $0x80] sm:$0xff]  }
  0x7d   :  { %1461 = vmatprep.subr.bf16.mxu0 %v1865_v0 }
  0x7f   :  { %1444 = vmatpush3.bf16.msra.mxu1 %v1632_v7 }
  0x80   :  { %1445 = vmatprep.subr.bf16.mxu1 %v1865_v0  ;;  %1462 = vmatpush3.bf16.msra.mxu0 %v1639_v14  ;;  %v1661_v14 = vld [vmem:[#allocation7 + $0x88] sm:$0xff]  }
  0x81   :  { %1463 = vmatprep.subr.bf16.mxu0 %v1865_v0 }
  0x83   :  { %1446 = vmatpush3.bf16.msra.mxu1 %v1633_v8 }
  0x84   :  { %1447 = vmatprep.subr.bf16.mxu1 %v1865_v0  ;;  %1464 = vmatpush3.bf16.msra.mxu0 %v1640_v15  ;;  %v1662_v15 = vld [vmem:[#allocation7 + $0x90] sm:$0xff]  }
  0x85   :  { %1465 = vmatprep.subr.bf16.mxu0 %v1865_v0 }
  0x87   :  { %1448 = vmatpush3.bf16.msra.mxu1 %v1634_v9 }
  0x88   :  { %1449 = vmatprep.subr.bf16.mxu1 %v1865_v0  ;;  %1466 = vmatpush3.bf16.msra.mxu0 %v1641_v16  ;;  %v1663_v16 = vld [vmem:[#allocation7 + $0x98] sm:$0xff]  }
  0x89   :  { %1467 = vmatprep.subr.bf16.mxu0 %v1865_v0 }
  0x8b   :  { %1450 = vmatpush3.bf16.msra.mxu1 %v1635_v10 }
  0x8c   :  { %1475 = vmatprep.subr.bf16.mxu1 %v1865_v0  ;;  %1468 = vmatpush3.bf16.msra.mxu0 %v1642_v22 }
  0x8d   :  { %1469 = vmatprep.subr.bf16.mxu0 %v1865_v0 }
  0x90   :  { %1470 = vmatpush3.bf16.msra.mxu0 %v1643_v23 }
  0x91   :  { %1481 = vmatprep.subr.bf16.mxu0 %v1865_v0 }
 0x145   :  { %v175_v17 = vpop.f32.mrb[0].mxu0 }
 0x146   :  { %v1433_v18 = vpop.f32.mrb[1].mxu0 }
 0x147   :  { %v178_v19 = vpop.f32.mrb[2].mxu0  ;;  %v1665_v18 = vld [vmem:[#allocation7 + $0xa8] sm:$0xff]  }
 0x148   :  { %v182_v20 = vpack.c.bf16 %v178_v19, %v175_v17  ;;  %v1434_v21 = vpop.f32.mrb[3].mxu0  ;;  %v1664_v17 = vld [vmem:[#allocation7 + $0xa0] sm:$0xff]   ;;  %v1666_v19 = vld [vmem:[#allocation7 + $0xb0] sm:$0xff]  }
 0x14a   :  { %1452 = vmatmul.mubr.bf16.vlgmr.msra.gmra.mrb[0].mxu1 %v182_v20  ;;  %v1299_v20 = vld [vmem:[%s2186_s5 + $0x1] ss:$0 sm:$0xff] }
 0x14b   :  { %1477 = vmatprep.mubr.msk.bf16.mxu1 %vm1866_vm0, %v1865_v0 }
 0x21d   :  { %v288_v25 = vpop.f32.mrb[0].mxu1 }
 0x21e   :  { %v289_v26 = vadd.f32 %v1269_v24, %v288_v25  ;;  %v1453_v27 = vpop.f32.mrb[1].mxu1 }
 0x21f   :  { %v291_v28 = vpop.f32.mrb[2].mxu1 }
 0x220   :  { %v292_v29 = vadd.f32 %v1269_v24, %v291_v28  ;;  %v1454_v30 = vpop.f32.mrb[3].mxu1  ;;  %v295_v31 = vmax.f32 %v289_v26, 0.0 }
 0x221   :  { %v1667_v30 = vld [vmem:[#allocation7 + $0xb8] sm:$0xff]  }
 0x222   :  { %v296_v32 = vmax.f32 %v292_v29, 0.0 }
 0x224   :  { %v297_v33 = vpack.c.bf16 %v296_v32, %v295_v31  ;;  %v1668_v31 = vld [vmem:[#allocation8 + $0x80] sm:$0xff]   ;;  %v1669_v32 = vld [vmem:[#allocation8 + $0x88] sm:$0xff]  }
 0x226   :  { %1472 = vmatmul.mubr.bf16.vlgmr.msra.gmra.mrb[4].mxu0 %v297_v33  ;;  %v1670_v33 = vld [vmem:[#allocation8 + $0x90] sm:$0xff]  }
 0x227   :  { %1497 = vmatprep.mubr.msk.bf16.mxu0 %vm1866_vm0, %v1865_v0  ;;  %1482 = vmatpush3.bf16.msra.mxu0 %v1644_v34  ;;  %v1671_v34 = vld [vmem:[#allocation8 + $0x98] sm:$0xff]  }
 0x228   :  { %1483 = vmatprep.subr.bf16.mxu0 %v1865_v0 }
 0x22b   :  { %1484 = vmatpush3.bf16.msra.mxu0 %v1645_v35  ;;  %v1673_v35 = vld [vmem:[#allocation8 + $0xa8] sm:$0xff]  }
 0x22c   :  { %1485 = vmatprep.subr.bf16.mxu0 %v1865_v0 }
 0x22f   :  { %1486 = vmatpush3.bf16.msra.mxu0 %v1646_v36 }
 0x230   :  { %1487 = vmatprep.subr.bf16.mxu0 %v1865_v0 }
 0x233   :  { %1488 = vmatpush3.bf16.msra.mxu0 %v1647_v37 }
 0x234   :  { %1489 = vmatprep.subr.bf16.mxu0 %v1865_v0 }
 0x237   :  { %1490 = vmatpush3.bf16.msra.mxu0 %v1648_v38 }
 0x238   :  { %1491 = vmatprep.subr.bf16.mxu0 %v1865_v0 }
 0x23b   :  { %1492 = vmatpush3.bf16.msra.mxu0 %v1649_v39 }
 0x23c   :  { %1493 = vmatprep.subr.bf16.mxu0 %v1865_v0 }
 0x23f   :  { %1494 = vmatpush3.bf16.msra.mxu0 %v1650_v40 }
 0x240   :  { %1495 = vmatprep.subr.bf16.mxu0 %v1865_v0 }
 0x243   :  { %1496 = vmatpush3.bf16.msra.mxu0 %v1651_v51 }
 0x244   :  { %1521 = vmatprep.subr.bf16.mxu0 %v1865_v0 }
 0x2f9   :  { %v403_v42 = vpop.f32.mrb[4].mxu0 }
 0x2fa   :  { %v404_v43 = vadd.f32 %v1278_v41, %v403_v42  ;;  %v1473_v44 = vpop.f32.mrb[5].mxu0  ;;  %v1675_v42 = vld [vmem:[#allocation8 + $0xb8] sm:$0xff]  }
 0x2fb   :  { %v406_v45 = vpop.f32.mrb[6].mxu0 }
 0x2fc   :  { %v407_v46 = vadd.f32 %v1278_v41, %v406_v45  ;;  %v1474_v47 = vpop.f32.mrb[7].mxu0  ;;  %v410_v48 = vmax.f32 %v404_v43, 0.0  ;;  %v1674_v41 = vld [vmem:[#allocation8 + $0xb0] sm:$0xff]  }
 0x2fd   :  { %v1310_v43 = vld [vmem:[%s2184_s3 + $0x2] ss:$0 sm:$0xff] }
 0x2fe   :  { %v411_v49 = vmax.f32 %v407_v46, 0.0 }
 0x300   :  { %v412_v50 = vpack.c.bf16 %v411_v49, %v410_v48 }
 0x302   :  { %1476 = vmatpush3.bf16.msra.mxu1 %v412_v50 }
 0x303   :  { %1501 = vmatprep.subr.bf16.mxu1 %v1865_v0 }
 0x305   :  { %1478 = vmatmul.mubr.msk.bf16.vlgmr.msra.gmra.mrb[4].mxu1 %vm137_vm1, %v2047_v2 }
 0x306   :  { %1517 = vmatprep.mubr.msk.bf16.mxu1 %vm1866_vm0, %v1865_v0  ;;  %1502 = vmatpush3.bf16.msra.mxu1 %v1652_v52 }
 0x307   :  { %1503 = vmatprep.subr.bf16.mxu1 %v1865_v0 }
 0x30a   :  { %1504 = vmatpush3.bf16.msra.mxu1 %v1653_v53  ;;  %v1677_v53 = vld [vmem:[#allocation10] sm:$0xff]  }
 0x30b   :  { %1505 = vmatprep.subr.bf16.mxu1 %v1865_v0 }
 0x30e   :  { %1506 = vmatpush3.bf16.msra.mxu1 %v1654_v54  ;;  %v1678_v54 = vld [vmem:[#allocation10 + $0x8] sm:$0xff]  }
 0x30f   :  { %1507 = vmatprep.subr.bf16.mxu1 %v1865_v0 }
 0x312   :  { %1508 = vmatpush3.bf16.msra.mxu1 %v1655_v55  ;;  %v1679_v55 = vld [vmem:[#allocation10 + $0x10] sm:$0xff]  }
 0x313   :  { %1509 = vmatprep.subr.bf16.mxu1 %v1865_v0 }
 0x316   :  { %1510 = vmatpush3.bf16.msra.mxu1 %v1656_v56  ;;  %v1680_v56 = vld [vmem:[#allocation10 + $0x18] sm:$0xff]  }
 0x317   :  { %1511 = vmatprep.subr.bf16.mxu1 %v1865_v0 }
 0x31a   :  { %1512 = vmatpush3.bf16.msra.mxu1 %v1657_v57  ;;  %v1681_v57 = vld [vmem:[#allocation10 + $0x20] sm:$0xff]  }
 0x31b   :  { %1513 = vmatprep.subr.bf16.mxu1 %v1865_v0 }
 0x31e   :  { %1514 = vmatpush3.bf16.msra.mxu1 %v1658_v63 }
 0x31f   :  { %1515 = vmatprep.subr.bf16.mxu1 %v1865_v0 }
 0x322   :  { %1516 = vmatpush3.bf16.msra.mxu1 %v1659_v1 }
 0x323   :  { %1527 = vmatprep.subr.bf16.mxu1 %v1865_v0 }
 0x3d8   :  { %v447_v58 = vpop.f32.mrb[4].mxu1 }
 0x3d9   :  { %v1479_v59 = vpop.f32.mrb[5].mxu1 }
 0x3da   :  { %v450_v60 = vpop.f32.mrb[6].mxu1  ;;  %v1683_v59 = vld [vmem:[#allocation10 + $0x30] sm:$0xff]  }
 0x3db   :  { %v454_v61 = vpack.c.bf16 %v450_v60, %v447_v58  ;;  %v1480_v62 = vpop.f32.mrb[7].mxu1  ;;  %v1682_v58 = vld [vmem:[#allocation10 + $0x28] sm:$0xff]   ;;  %v1320_v60 = vld [vmem:[%s2186_s5 + $0x2] ss:$0 sm:$0xff] }
 0x3dd   :  { %1498 = vmatmul.mubr.bf16.vlgmr.msra.gmra.mrb[8].mxu0 %v454_v61 }
 0x3de   :  { %1523 = vmatprep.mubr.msk.bf16.mxu0 %vm1866_vm0, %v1865_v0 }
 0x4b0   :  { %v562_v4 = vpop.f32.mrb[8].mxu0 }
 0x4b1   :  { %v563_v5 = vadd.f32 %v1289_v3, %v562_v4  ;;  %v1499_v6 = vpop.f32.mrb[9].mxu0 }
 0x4b2   :  { %v565_v7 = vpop.f32.mrb[10].mxu0 }
 0x4b3   :  { %v566_v8 = vadd.f32 %v1289_v3, %v565_v7  ;;  %v1500_v9 = vpop.f32.mrb[11].mxu0  ;;  %v569_v10 = vmax.f32 %v563_v5, 0.0 }
 0x4b4   :  { %v1684_v9 = vld [vmem:[#allocation10 + $0x38] sm:$0xff]  }
 0x4b5   :  { %v570_v11 = vmax.f32 %v566_v8, 0.0  ;;  %v1676_v8 = vld [vmem:[%s2187_s6] sm:$0xff]  }
 0x4b7   :  { %v571_v12 = vpack.c.bf16 %v570_v11, %v569_v10  ;;  %v1685_v10 = vld [vmem:[#allocation11] sm:$0xff]   ;;  %v1686_v11 = vld [vmem:[#allocation11 + $0x8] sm:$0xff]  }
 0x4b9   :  { %1518 = vmatmul.mubr.bf16.vlgmr.msra.gmra.mrb[8].mxu1 %v571_v12  ;;  %v1687_v12 = vld [vmem:[#allocation11 + $0x10] sm:$0xff]  }
 0x4ba   :  { %1543 = vmatprep.mubr.msk.bf16.mxu1 %vm1866_vm0, %v1865_v0  ;;  %1528 = vmatpush3.bf16.msra.mxu1 %v1660_v13  ;;  %v1688_v13 = vld [vmem:[#allocation11 + $0x18] sm:$0xff]  }
 0x4bb   :  { %1529 = vmatprep.subr.bf16.mxu1 %v1865_v0 }
 0x4be   :  { %1530 = vmatpush3.bf16.msra.mxu1 %v1661_v14  ;;  %v1689_v14 = vld [vmem:[#allocation11 + $0x20] sm:$0xff]  }
 0x4bf   :  { %1531 = vmatprep.subr.bf16.mxu1 %v1865_v0 }
 0x4c2   :  { %1532 = vmatpush3.bf16.msra.mxu1 %v1662_v15  ;;  %v1690_v15 = vld [vmem:[#allocation11 + $0x28] sm:$0xff]  }
 0x4c3   :  { %1533 = vmatprep.subr.bf16.mxu1 %v1865_v0 }
 0x4c6   :  { %1534 = vmatpush3.bf16.msra.mxu1 %v1663_v16 }
 0x4c7   :  { %1535 = vmatprep.subr.bf16.mxu1 %v1865_v0 }
 0x4ca   :  { %1536 = vmatpush3.bf16.msra.mxu1 %v1664_v17 }
 0x4cb   :  { %1537 = vmatprep.subr.bf16.mxu1 %v1865_v0 }
 0x4ce   :  { %1538 = vmatpush3.bf16.msra.mxu1 %v1665_v18 }
 0x4cf   :  { %1539 = vmatprep.subr.bf16.mxu1 %v1865_v0 }
 0x4d2   :  { %1540 = vmatpush3.bf16.msra.mxu1 %v1666_v19 }
 0x4d3   :  { %1541 = vmatprep.subr.bf16.mxu1 %v1865_v0 }
 0x4d6   :  { %1542 = vmatpush3.bf16.msra.mxu1 %v1667_v30 }
 0x4d7   :  { %1567 = vmatprep.subr.bf16.mxu1 %v1865_v0 }
 0x58c   :  { %v679_v21 = vpop.f32.mrb[8].mxu1 }
 0x58d   :  { %v680_v22 = vadd.f32 %v1299_v20, %v679_v21  ;;  %v1519_v23 = vpop.f32.mrb[9].mxu1  ;;  %v1691_v21 = vld [vmem:[#allocation11 + $0x30] sm:$0xff]  }
 0x58e   :  { %v682_v24 = vpop.f32.mrb[10].mxu1  ;;  %v1331_v23 = vld [vmem:[%s2189_s8] ss:$0 sm:$0xff]  ;;  %s1825_s8 = scalar_lea.vmem %s1252_s18, 256 }
 0x58f   :  { %v683_v25 = vadd.f32 %v1299_v20, %v682_v24  ;;  %v1520_v26 = vpop.f32.mrb[11].mxu1  ;;  %v686_v27 = vmax.f32 %v680_v22, 0.0  ;;  %v1692_v22 = vld [vmem:[#allocation11 + $0x38] sm:$0xff]   ;;  %p1826_p6 = scmp.ne.s32.totalorder %s1252_s18, %s1825_s8  ;;  %p1831_p8 = scmp.lt.s32.totalorder %s1825_s8, %s1825_s8 }
 0x591   :  { %v687_v28 = vmax.f32 %v683_v25, 0.0  ;;  %p1832_p9 = por %p1831_p8, %p1830_p7 }
 0x593   :  { %v688_v29 = vpack.c.bf16 %v687_v28, %v686_v27  ;;  %p1833_p10 = pnand %p1832_p9, %p1826_p6 }
 0x595   :  { %1522 = vmatpush3.bf16.msra.mxu0 %v688_v29 }
 0x596   :  { %1547 = vmatprep.subr.bf16.mxu0 %v1865_v0 }
 0x598   :  { %1524 = vmatmul.mubr.msk.bf16.vlgmr.msra.gmra.mrb[12].mxu0 %vm137_vm1, %v2047_v2  ;;  %v1672_v2 = vld [vmem:[#allocation8 + $0xa0] sm:$0xff]  }
 0x599   :  { %1563 = vmatprep.mubr.msk.bf16.mxu0 %vm1866_vm0, %v1865_v0  ;;  %1548 = vmatpush3.bf16.msra.mxu0 %v1668_v31 }
 0x59a   :  { %1549 = vmatprep.subr.bf16.mxu0 %v1865_v0 }
 0x59d   :  { %1550 = vmatpush3.bf16.msra.mxu0 %v1669_v32 }
 0x59e   :  { %1551 = vmatprep.subr.bf16.mxu0 %v1865_v0 }
 0x5a1   :  { %1552 = vmatpush3.bf16.msra.mxu0 %v1670_v33 }
 0x5a2   :  { %1553 = vmatprep.subr.bf16.mxu0 %v1865_v0 }
 0x5a5   :  { %1554 = vmatpush3.bf16.msra.mxu0 %v1671_v34 }
 0x5a6   :  { %1555 = vmatprep.subr.bf16.mxu0 %v1865_v0 }
 0x5a9   :  { %1556 = vmatpush3.bf16.msra.mxu0 %v1672_v2 }
 0x5aa   :  { %1557 = vmatprep.subr.bf16.mxu0 %v1865_v0 }
 0x5ad   :  { %1558 = vmatpush3.bf16.msra.mxu0 %v1673_v35 }
 0x5ae   :  { %1559 = vmatprep.subr.bf16.mxu0 %v1865_v0 }
 0x5b1   :  { %1560 = vmatpush3.bf16.msra.mxu0 %v1674_v41 }
 0x5b2   :  { %1561 = vmatprep.subr.bf16.mxu0 %v1865_v0 }
 0x5b5   :  { %1562 = vmatpush3.bf16.msra.mxu0 %v1675_v42 }
 0x5b6   :  { %1573 = vmatprep.subr.bf16.mxu0 %v1865_v0 }
 0x66b   :  { %v723_v36 = vpop.f32.mrb[12].mxu0 }
 0x66c   :  { %v1525_v37 = vpop.f32.mrb[13].mxu0 }
 0x66d   :  { %v726_v38 = vpop.f32.mrb[14].mxu0 }
 0x66e   :  { %v730_v39 = vpack.c.bf16 %v726_v38, %v723_v36  ;;  %v1526_v40 = vpop.f32.mrb[15].mxu0 }
 0x670   :  { %1544 = vmatmul.mubr.bf16.vlgmr.msra.gmra.mrb[12].mxu1 %v730_v39 }
 0x671   :  { %1569 = vmatprep.mubr.msk.bf16.mxu1 %vm1866_vm0, %v1865_v0 }
 0x743   :  { %v838_v44 = vpop.f32.mrb[12].mxu1 }
 0x744   :  { %v839_v45 = vadd.f32 %v1310_v43, %v838_v44  ;;  %v1545_v46 = vpop.f32.mrb[13].mxu1 }
 0x745   :  { %v841_v47 = vpop.f32.mrb[14].mxu1 }
 0x746   :  { %v842_v48 = vadd.f32 %v1310_v43, %v841_v47  ;;  %v1546_v49 = vpop.f32.mrb[15].mxu1  ;;  %v845_v50 = vmax.f32 %v839_v45, 0.0 }
 0x748   :  { %v846_v51 = vmax.f32 %v842_v48, 0.0 }
 0x74a   :  { %v847_v52 = vpack.c.bf16 %v846_v51, %v845_v50 }
 0x74c   :  { %1564 = vmatmul.mubr.bf16.vlgmr.msra.gmra.mrb[16].mxu0 %v847_v52 }
 0x74d   :  { %1589 = vmatprep.mubr.msk.bf16.mxu0 %vm1866_vm0, %v1865_v0  ;;  %1574 = vmatpush3.bf16.msra.mxu0 %v1677_v53 }
 0x74e   :  { %1575 = vmatprep.subr.bf16.mxu0 %v1865_v0 }
 0x751   :  { %1576 = vmatpush3.bf16.msra.mxu0 %v1678_v54 }
 0x752   :  { %1577 = vmatprep.subr.bf16.mxu0 %v1865_v0 }
 0x755   :  { %1578 = vmatpush3.bf16.msra.mxu0 %v1679_v55 }
 0x756   :  { %1579 = vmatprep.subr.bf16.mxu0 %v1865_v0 }
 0x759   :  { %1580 = vmatpush3.bf16.msra.mxu0 %v1680_v56 }
 0x75a   :  { %1581 = vmatprep.subr.bf16.mxu0 %v1865_v0 }
 0x75d   :  { %1582 = vmatpush3.bf16.msra.mxu0 %v1681_v57 }
 0x75e   :  { %1583 = vmatprep.subr.bf16.mxu0 %v1865_v0 }
 0x761   :  { %1584 = vmatpush3.bf16.msra.mxu0 %v1682_v58 }
 0x762   :  { %1585 = vmatprep.subr.bf16.mxu0 %v1865_v0 }
 0x765   :  { %1586 = vmatpush3.bf16.msra.mxu0 %v1683_v59 }
 0x766   :  { %1587 = vmatprep.subr.bf16.mxu0 %v1865_v0 }
 0x769   :  { %1588 = vmatpush3.bf16.msra.mxu0 %v1684_v9 }
 0x81f   :  { %v955_v61 = vpop.f32.mrb[16].mxu0 }
 0x820   :  { %v956_v62 = vadd.f32 %v1320_v60, %v955_v61  ;;  %v1565_v63 = vpop.f32.mrb[17].mxu0 }
 0x821   :  { %v958_v1 = vpop.f32.mrb[18].mxu0 }
 0x822   :  { %v959_v3 = vadd.f32 %v1320_v60, %v958_v1  ;;  %v1566_v4 = vpop.f32.mrb[19].mxu0  ;;  %v962_v5 = vmax.f32 %v956_v62, 0.0 }
 0x824   :  { %v963_v6 = vmax.f32 %v959_v3, 0.0 }
 0x826   :  { %v964_v7 = vpack.c.bf16 %v963_v6, %v962_v5 }
 0x828   :  { %1568 = vmatpush3.bf16.msra.mxu1 %v964_v7 }
 0x829   :  { %1593 = vmatprep.subr.bf16.mxu1 %v1865_v0 }
 0x82b   :  { %1570 = vmatmul.mubr.msk.bf16.vlgmr.msra.gmra.mrb[16].mxu1 %vm137_vm1, %v1676_v8 }
 0x82c   :  { %1609 = vmatprep.mubr.msk.bf16.mxu1 %vm1866_vm0, %v1865_v0  ;;  %1594 = vmatpush3.bf16.msra.mxu1 %v1685_v10 }
 0x82d   :  { %1595 = vmatprep.subr.bf16.mxu1 %v1865_v0 }
 0x830   :  { %1596 = vmatpush3.bf16.msra.mxu1 %v1686_v11 }
 0x831   :  { %1597 = vmatprep.subr.bf16.mxu1 %v1865_v0 }
 0x834   :  { %1598 = vmatpush3.bf16.msra.mxu1 %v1687_v12 }
 0x835   :  { %1599 = vmatprep.subr.bf16.mxu1 %v1865_v0 }
 0x838   :  { %1600 = vmatpush3.bf16.msra.mxu1 %v1688_v13 }
 0x839   :  { %1601 = vmatprep.subr.bf16.mxu1 %v1865_v0 }
 0x83c   :  { %1602 = vmatpush3.bf16.msra.mxu1 %v1689_v14 }
 0x83d   :  { %1603 = vmatprep.subr.bf16.mxu1 %v1865_v0 }
 0x840   :  { %1604 = vmatpush3.bf16.msra.mxu1 %v1690_v15 }
 0x841   :  { %1605 = vmatprep.subr.bf16.mxu1 %v1865_v0 }
 0x844   :  { %1606 = vmatpush3.bf16.msra.mxu1 %v1691_v21 }
 0x845   :  { %1607 = vmatprep.subr.bf16.mxu1 %v1865_v0  ;;  %v1340_v0 = vld [vmem:[%s2191_s10] ss:$0 sm:$0xff] }
 0x848   :  { %1608 = vmatpush3.bf16.msra.mxu1 %v1692_v22 }
 0x8fe   :  { %v1009_v16 = vpop.f32.mrb[16].mxu1 }
 0x8ff   :  { %v1571_v17 = vpop.f32.mrb[17].mxu1 }
 0x900   :  { %v1012_v18 = vpop.f32.mrb[18].mxu1 }
 0x901   :  { %v1016_v19 = vpack.c.bf16 %v1012_v18, %v1009_v16  ;;  %v1572_v20 = vpop.f32.mrb[19].mxu1 }
 0x903   :  { %1590 = vmatmul.mubr.bf16.vlgmr.msra.gmra.mrb[20].mxu0 %v1016_v19 }
 0x9d6   :  { %v1122_v24 = vpop.f32.mrb[20].mxu0 }
 0x9d7   :  { %v1123_v25 = vadd.f32 %v1331_v23, %v1122_v24  ;;  %v1591_v26 = vpop.f32.mrb[21].mxu0 }
 0x9d8   :  { %v1125_v27 = vpop.f32.mrb[22].mxu0 }
 0x9d9   :  { %v1126_v28 = vadd.f32 %v1331_v23, %v1125_v27  ;;  %v1592_v29 = vpop.f32.mrb[23].mxu0  ;;  %v1129_v30 = vmax.f32 %v1123_v25, 0.0 }
 0x9db   :  { %v1130_v31 = vmax.f32 %v1126_v28, 0.0 }
 0x9dd   :  { %v1131_v32 = vpack.c.bf16 %v1130_v31, %v1129_v30 }
 0x9df   :  { %1610 = vmatmul.mubr.bf16.vlgmr.msra.gmra.mrb[20].mxu1 %v1131_v32 }
 0xab2   :  { %v1237_v33 = vpop.f32.mrb[20].mxu1 }
 0xab3   :  { %v1238_v34 = vadd.f32 %v1340_v0, %v1237_v33  ;;  %v1611_v2 = vpop.f32.mrb[21].mxu1 }
 0xab4   :  { %v1240_v35 = vpop.f32.mrb[22].mxu1 }
 0xab5   :  { %1244 = vst [vmem:[#allocation13] sm:$0xff] %v1238_v34  ;;  %v1241_v36 = vadd.f32 %v1340_v0, %v1240_v35  ;;  %v1612_v37 = vpop.f32.mrb[23].mxu1 }
 0xab7   :  { %1245 = vst [vmem:[#allocation13 + $0x8] sm:$0xff] %v1241_v36 }
 0xab8   :  { %1836 = shalt.err (!%p1833_p10)
}
 0xab9   :  { %s1837_s26 = scalar_lea.hbm %s2192_s11, 256 }
 0xaba   :  { %p1838_p11 = scmp.ne.s32.totalorder %s2192_s11, %s1837_s26  ;;  %p1841_p12 = scmp.lt.u32.totalorder %s1837_s26, %s2192_s11 }
 0xabc   :  { %p1843_p13 = pnand %p1841_p12, %p1838_p11 }
 0xabe   :  { %1846 = shalt.err (!%p1843_p13)
}
 0xabf   :  { %s1868_s7 = smov 128   ;;  %s1869_s13 = smov 8  }
 0xac0   :  { %1257 = dma.vmem_to_hbm [thread:$0]  %s1252_s18, 256, %s2192_s11, [#allocation4], %s1868_s7, %s1868_s7, %s1869_s13  }
 0xac1   :  { %1855 = dma.done.wait [#allocation4], 256  }
 0xac2   :  { %1856 = vsyncadd [#allocation4], 4294967040 }
 0xac3   :  { %1261 = vsyncpa [#allocation3], 1 }
 0xac4   :  { %1262 = vsyncpa [#allocation6], 1 }
 0xac5   :  { %1263 = vsyncpa [#allocation9], 1 }
 0xac6   :  { %1264 = vsyncpa [#allocation12], 1 }
 0xac7   :  { %1265 = vsyncpa [#allocation4], 1 }

</bundles_post_ra>
